<compile_context>
chip_gen: v7x
topology: tpu7x:2x2x1
jax: 0.10.0
libtpu: 0.0.40
codegen_flags: <defaults>
</compile_context>

<pallas_src>
from math import gcd

import jax
import jax.numpy as jnp
from jax.experimental import pallas as pl
from jax.experimental.pallas import tpu as pltpu


def _copy_kernel(x_ref, o_ref):
    # Hot path: whole-tile VMEM copy (identity).
    o_ref[...] = x_ref[...]


def _row_align(itemsize):
    # Sublane packing: one vreg holds (8 * 4/itemsize, 128) elements; keep row
    # tiles at the packed granularity to avoid masked sublane stores.
    return {8: 8, 4: 8, 2: 16, 1: 32}.get(itemsize, 8)


def _round_down(v, m):
    return (v // m) * m


def _hw_block_params():
    """(block_bytes, vmem_limit_bytes) chosen per TPU generation."""
    vmem = None
    try:
        vmem = getattr(pltpu.get_tpu_info(), "vmem_capacity_bytes", None)
    except Exception:  # CPU / interpret / unknown runtime: stay conservative.
        vmem = None
    if vmem is not None and vmem >= 96 * 1024 * 1024:
        # v5e / v6e: 128 MiB VMEM -> 16 MiB blocks (4x double-buffers = 64 MiB).
        return 16 * 1024 * 1024, 96 * 1024 * 1024
    # v7x (64 MiB VMEM) or unknown: 8 MiB blocks (4x double-buffers = 32 MiB).
    return 8 * 1024 * 1024, 48 * 1024 * 1024


def _pallas_identity_copy(x):
    """Bit-exact copy of `x` through a single Pallas TPU kernel."""
    orig_shape = x.shape
    dtype = x.dtype
    itemsize = jnp.dtype(dtype).itemsize
    n = x.size
    if n == 0:
        return x

    block_bytes, vmem_limit = _hw_block_params()
    cost = pl.CostEstimate(flops=0, transcendentals=0,
                           bytes_accessed=2 * n * itemsize)
    params = pltpu.CompilerParams(
        dimension_semantics=("parallel",),   # shards grid across TCs on v7x
        vmem_limit_bytes=vmem_limit,
    )

    if n % 128 == 0:
        # Lane-dense slab: cols = 128 * gcd(n/128, 256) (up to 32768 lanes),
        # rows = n / cols.  Reshape of a contiguous array is free to XLA.
        m = n // 128
        c_blocks = gcd(m, 256)
        cols = 128 * c_blocks
        rows = m // c_blocks
        slab = jnp.reshape(x, (rows, cols))

        bytes_per_row = cols * itemsize
        align = _row_align(itemsize)
        tile_rows = max(1, block_bytes // bytes_per_row)
        if rows * bytes_per_row > 2 * 1024 * 1024:
            # Guarantee >= ~4 grid steps so in-DMA(i+1) overlaps out-DMA(i-1).
            tile_rows = min(tile_rows, max(1, -(-rows // 4)))
        tile_rows = min(tile_rows, rows)
        if tile_rows < rows:
            # Sublane-pack aligned; the cdiv grid masks the ragged last block.
            tile_rows = max(align, _round_down(tile_rows, align))
        grid = (pl.cdiv(rows, tile_rows),)

        out = pl.pallas_call(
            _copy_kernel,
            out_shape=jax.ShapeDtypeStruct((rows, cols), dtype),
            grid_spec=pltpu.PrefetchScalarGridSpec(
                num_scalar_prefetch=0,
                grid=grid,
                in_specs=[pl.BlockSpec((tile_rows, cols), lambda i: (i, 0))],
                out_specs=pl.BlockSpec((tile_rows, cols), lambda i: (i, 0)),
            ),
            compiler_params=params,
            cost_estimate=cost,
            # Under jit the output lands in the (otherwise dead) input buffer:
            # no fresh HBM allocation.  Eager callers just see a safe copy.
            input_output_aliases={0: 0},
        )(slab)
        return jnp.reshape(out, orig_shape)

    # Fallback: n not a multiple of 128 — lane-tile the flat (1, n) view so
    # VMEM stays bounded even for very large awkward sizes.
    # TODO(synk): only 1 of 8 sublanes per vreg is used here; route a
    # 128-aligned prefix through the main path if this ever becomes hot.
    max_tile_cols = max(128, _round_down(block_bytes // itemsize, 128))
    tile_cols = n if n <= max_tile_cols else max_tile_cols
    grid = (pl.cdiv(n, tile_cols),)

    out = pl.pallas_call(
        _copy_kernel,
        out_shape=jax.ShapeDtypeStruct((1, n), dtype),
        grid_spec=pltpu.PrefetchScalarGridSpec(
            num_scalar_prefetch=0,
            grid=grid,
            in_specs=[pl.BlockSpec((1, tile_cols), lambda i: (0, i))],
            out_specs=pl.BlockSpec((1, tile_cols), lambda i: (0, i)),
        ),
        compiler_params=params,
        cost_estimate=cost,
        input_output_aliases={0: 0},
    )(jnp.reshape(x, (1, n)))
    return jnp.reshape(out, orig_shape)


_TINY_BYTES = 1 << 20  # below this, launch overhead >> data movement


def mean_encoder_forward(x, *, min_pallas_bytes=_TINY_BYTES):
    """Identity: returns x unchanged (same shape, dtype, values)."""
    nbytes = x.size * jnp.dtype(x.dtype).itemsize
    if x.size == 0 or nbytes < min_pallas_bytes:
        # Pure identity: skipping the custom call entirely is strictly faster
        # for small tensors and trivially safe.
        return x
    return _pallas_identity_copy(x)


class MeanEncoder:
    """Identity function (JAX/Pallas port of miro.MeanEncoder)."""

    def __init__(self, shape):
        # No parameters; `shape` stored only for parity with the PyTorch module.
        self.shape = shape

    def __call__(self, x):
        return mean_encoder_forward(x)


if __name__ == "__main__":
    key = jax.random.PRNGKey(0)
    # NCHW input, small shapes: batch=2, channels=4, spatial=16x16.
    x = jax.random.normal(key, (2, 4, 16, 16), dtype=jnp.float32)

    enc = MeanEncoder(shape=x.shape)
    y = jax.block_until_ready(enc(x))          # tiny -> identity short-circuit
    assert y.shape == x.shape and y.dtype == x.dtype
    assert bool(jnp.all(y == x))

    # Force the Pallas copy path once (main lane-dense branch: 2048 % 128 == 0)
    # so the kernel itself compiles and runs on the TPU.
    y2 = jax.block_until_ready(mean_encoder_forward(x, min_pallas_bytes=0))
    assert y2.shape == x.shape and y2.dtype == x.dtype
    assert bool(jnp.all(y2 == x))

    # Also exercise the hardened non-128-multiple fallback.
    z = jax.random.normal(jax.random.PRNGKey(0), (3, 5, 7), dtype=jnp.float32)
    z2 = jax.block_until_ready(mean_encoder_forward(z, min_pallas_bytes=0))
    assert z2.shape == z.shape and z2.dtype == z.dtype
    assert bool(jnp.all(z2 == z))

    print("KERNEL_OK")
</pallas_src>

<mosaic_0001>
module attributes {stable_mosaic.version = 11 : i64} {
  func.func @_copy_kernel(%arg0: i32, %arg1: memref<1x2048xf32, #tpu.memory_space<vmem>>, %arg2: memref<1x2048xf32, #tpu.memory_space<vmem>>) attributes {dimension_semantics = [#tpu.dimension_semantics<parallel>], iteration_bounds = array<i64: 1>, scalar_prefetch = 0 : i64, scratch_operands = 0 : i64, tpu.core_type = #tpu.core_type<tc>, window_params = [{transform_indices = @transform_0, window_bounds = array<i64: 1, 2048>}, {transform_indices = @transform_1, window_bounds = array<i64: 1, 2048>}]} {
    %c0 = arith.constant 0 : index
    %c0_0 = arith.constant 0 : index
    %0 = vector.load %arg1[%c0, %c0_0] : memref<1x2048xf32, #tpu.memory_space<vmem>>, vector<1x2048xf32>
    %c0_1 = arith.constant 0 : index
    %c0_2 = arith.constant 0 : index
    %1 = vector.load %arg2[%c0_1, %c0_2] : memref<1x2048xf32, #tpu.memory_space<vmem>>, vector<1x2048xf32>
    tpu.vector_store %arg2[%c0_1, %c0_2], %0 {strides = array<i32>} : memref<1x2048xf32, #tpu.memory_space<vmem>>, vector<1x2048xf32>,
    return
  }
  func.func @transform_0(%arg0: i32) -> (i32, i32) {
    %c0_i32 = arith.constant 0 : i32
    %c0_i32_0 = arith.constant 0 : i32
    return %arg0, %c0_i32 : i32, i32
  }
  func.func @transform_1(%arg0: i32) -> (i32, i32) {
    %c0_i32 = arith.constant 0 : i32
    %c0_i32_0 = arith.constant 0 : i32
    return %arg0, %c0_i32 : i32, i32
  }
}

</mosaic_0001>

<bundles_post_ra>
// kernel: tpu_custom_call.1
= control target key start
LH: loop header
LB: loop body
LE: loop exit
PB: predicated region body
PF: predicated region fallthrough
CT: control target
= control target key end

     0   :  { %6 = vsyncpa [#allocation3], 0  ;;  %s126_s0 = inlined_call_operand.hbm [shape: f32[1,2048], index: 0, kind: input, shape index: {}, may-alias: {0,1}]   ;;  %s127_s1 = inlined_call_operand.hbm [shape: f32[1,2048], index: 1, kind: output, shape index: {}, may-alias: {0,1}]  }
   0x1   :  { %7 = vsyncpa [#allocation4], 0  ;;  %s90_s6 = smov [#allocation2]   ;;  %s42_s10 = scalar_lea.hbm %s126_s0, 256 }
   0x2   :  { %s14_s7 = sshll.u32 %s90_s6, 4  ;;  %p43_p0 = scmp.ne.s32.totalorder %s126_s0, %s42_s10  ;;  %s15_s7 = int_to_ptr.vmem [resolvable:$true] %s14_s7 }
   0x3   :  { %p46_p1 = scmp.lt.u32.totalorder %s42_s10, %s126_s0 }
   0x5   :  { %p48_p2 = pnand %p46_p1, %p43_p0 }
   0x7   :  { %51 = shalt.err (!%p48_p2)
}
   0x8   :  { %s52_s15 = scalar_lea.vmem %s15_s7, 256  ;;  %p57_p4 = scmp.lt.s32.totalorder %s15_s7, %s15_s7 }
   0x9   :  { %p53_p3 = scmp.ne.s32.totalorder %s15_s7, %s52_s15  ;;  %p58_p5 = scmp.lt.s32.totalorder %s52_s15, %s52_s15 }
   0xb   :  { %p59_p6 = por %p58_p5, %p57_p4 }
   0xd   :  { %p60_p7 = pnand %p59_p6, %p53_p3 }
   0xf   :  { %63 = shalt.err (!%p60_p7)
}
  0x10   :  { %17 = dma.hbm_to_vmem [thread:$0]  %s126_s0, 256, %s15_s7, [#allocation3]  }
  0x11   :  { %86 = dma.done.wait [#allocation3], 256  }
  0x12   :  { %87 = vsyncadd [#allocation3], 4294967040  ;;  %s91_s18 = smov [#allocation5]   ;;  %v21_v0 = vld [vmem:[#allocation2] sm:$0xff]  ;;  %v22_v1 = vld [vmem:[#allocation2 + $0x8] sm:$0xff] }
  0x13   :  { %s31_s19 = sshll.u32 %s91_s18, 4  ;;  %23 = vst [vmem:[#allocation5] sm:$0xff] %v21_v0  ;;  %24 = vst [vmem:[#allocation5 + $0x8] sm:$0xff] %v22_v1  ;;  %s32_s19 = int_to_ptr.vmem [resolvable:$true] %s31_s19 }
  0x14   :  { %s64_s20 = scalar_lea.vmem %s32_s19, 256  ;;  %p69_p9 = scmp.lt.s32.totalorder %s32_s19, %s32_s19 }
  0x15   :  { %p65_p8 = scmp.ne.s32.totalorder %s32_s19, %s64_s20  ;;  %p70_p10 = scmp.lt.s32.totalorder %s64_s20, %s64_s20 }
  0x17   :  { %p71_p11 = por %p70_p10, %p69_p9 }
  0x19   :  { %p72_p12 = pnand %p71_p11, %p65_p8 }
  0x1b   :  { %75 = shalt.err (!%p72_p12)
}
  0x1c   :  { %s76_s0 = scalar_lea.hbm %s127_s1, 256 }
  0x1d   :  { %p77_p13 = scmp.ne.s32.totalorder %s127_s1, %s76_s0  ;;  %p80_p0 = scmp.lt.u32.totalorder %s76_s0, %s127_s1 }
  0x1f   :  { %p82_p1 = pnand %p80_p0, %p77_p13 }
  0x21   :  { %85 = shalt.err (!%p82_p1)
}
  0x22   :  { %34 = dma.vmem_to_hbm [thread:$0]  %s32_s19, 256, %s127_s1, [#allocation4]  }
  0x23   :  { %88 = dma.done.wait [#allocation4], 256  }
  0x24   :  { %89 = vsyncadd [#allocation4], 4294967040 }
  0x25   :  { %38 = vsyncpa [#allocation3], 1 }
  0x26   :  { %39 = vsyncpa [#allocation4], 1 }

</bundles_post_ra>
